<compile_context>
chip_gen: v7x
topology: tpu7x:2x2x1
jax: 0.10.0
libtpu: 0.0.40
codegen_flags: <defaults>
</compile_context>

<pallas_src>
import functools

import jax
import jax.numpy as jnp
from jax.experimental import pallas as pl
from jax.experimental.pallas import tpu as pltpu


def _patching_kernel(x_ref, o_ref, *, C, ph, pw, w):
    """One (batch image, patch-row hi) slab.

    x_ref: (1, C, 1, ph*w, pw)   input slab  : x5[b, :, hi, :, :]
    o_ref: (1, 1, w*ph*pw, C)    output slab : out4[b, hi, :, :]
    """
    # Static (compile-time unrolled) loops over the small patch dimensions.
    for wi in range(w):
        for p in range(ph):
            # tile[c, q] = x[b, c, hi*ph + p, wi*pw + q]
            tile = x_ref[0, :, 0, p * w + wi, :]          # (C, pw)
            r0 = (wi * ph + p) * pw
            # out rows r0..r0+pw-1, all C feature lanes:
            # out[b, hi*w + wi, (p*pw + q)*C + c] = tile[c, q]
            o_ref[0, 0, r0:r0 + pw, :] = tile.T           # (pw, C)


def patching_forward(x, x_patch_size, y_patch_size):
    """x: [B, C, H, W]  ->  [B, (H//ph)*(W//pw), ph*pw*C]  (einops rearrange)."""
    B, C, H, W = x.shape
    ph = int(y_patch_size)
    pw = int(x_patch_size)
    assert H % ph == 0 and W % pw == 0, "image dims must be divisible by patch size"
    h, w = H // ph, W // pw

    # Free (contiguous) reshapes — no data movement in the wrapper.
    x5 = x.reshape(B, C, h, ph * w, pw)

    kernel = functools.partial(_patching_kernel, C=C, ph=ph, pw=pw, w=w)

    out4 = pl.pallas_call(
        kernel,
        out_shape=jax.ShapeDtypeStruct((B, h, w * ph * pw, C), x.dtype),
        grid=(B, h),
        in_specs=[
            # last two block dims == full array dims -> always layout-legal
            pl.BlockSpec((1, C, 1, ph * w, pw), lambda b, hi: (b, 0, hi, 0, 0)),
        ],
        out_specs=pl.BlockSpec((1, 1, w * ph * pw, C), lambda b, hi: (b, hi, 0, 0)),
        compiler_params=pltpu.CompilerParams(
            # independent output blocks per (b, hi) -> shard across v7x megacore
            dimension_semantics=("parallel", "parallel"),
        ),
        cost_estimate=pl.CostEstimate(
            flops=0,
            transcendentals=0,
            bytes_accessed=2 * x.size * x.dtype.itemsize,
        ),
    )(x5)

    # Free reshape back to the module's output layout [B, h*w, ph*pw*C].
    return out4.reshape(B, h * w, ph * pw * C)


if __name__ == "__main__":
    # Small shapes consistent with the module docstring ([100,3,32,32] -> [100,64,48]),
    # just with a small batch.
    batch, C, H, W = 2, 3, 32, 32
    x_patch_size = 4
    y_patch_size = 4

    key = jax.random.PRNGKey(0)
    x = jax.random.normal(key, (batch, C, H, W), dtype=jnp.float32)

    out = patching_forward(x, x_patch_size, y_patch_size)
    out = jax.block_until_ready(out)

    # Pure-JAX reference: 'b c (h ph) (w pw) -> b (h w) (ph pw c)'
    h, w = H // y_patch_size, W // x_patch_size
    ref = x.reshape(batch, C, h, y_patch_size, w, x_patch_size)
    ref = jnp.transpose(ref, (0, 2, 4, 3, 5, 1))          # b, h, w, ph, pw, c
    ref = ref.reshape(batch, h * w, y_patch_size * x_patch_size * C)

    assert out.shape == (batch, h * w, y_patch_size * x_patch_size * C)
    assert jnp.array_equal(out, ref), "Pallas patching does not match reference"

    print("KERNEL_OK")
</pallas_src>

<mosaic_0001>
module attributes {stable_mosaic.version = 11 : i64} {
  func.func @_patching_kernel(%arg0: i32, %arg1: i32, %arg2: memref<1x3x1x32x4xf32, #tpu.memory_space<vmem>>, %arg3: memref<1x1x128x3xf32, #tpu.memory_space<vmem>>) attributes {dimension_semantics = [#tpu.dimension_semantics<parallel>, #tpu.dimension_semantics<parallel>], iteration_bounds = array<i64: 2, 8>, scalar_prefetch = 0 : i64, scratch_operands = 0 : i64, tpu.core_type = #tpu.core_type<tc>, window_params = [{transform_indices = @transform_0, window_bounds = array<i64: 1, 3, 1, 32, 4>}, {transform_indices = @transform_1, window_bounds = array<i64: 1, 1, 128, 3>}]} {
    %c0 = arith.constant 0 : index
    %c0_0 = arith.constant 0 : index
    %c0_1 = arith.constant 0 : index
    %c0_2 = arith.constant 0 : index
    %c0_3 = arith.constant 0 : index
    %0 = vector.load %arg2[%c0, %c0_0, %c0_1, %c0_2, %c0_3] : memref<1x3x1x32x4xf32, #tpu.memory_space<vmem>>, vector<1x3x1x1x4xf32>
    %1 = vector.shape_cast %0 : vector<1x3x1x1x4xf32> to vector<3x4xf32>
    %2 = tpu.transpose %1, [1, 0] : vector<3x4xf32> -> vector<4x3xf32>
    %c0_4 = arith.constant 0 : index
    %c0_5 = arith.constant 0 : index
    %c0_6 = arith.constant 0 : index
    %c0_7 = arith.constant 0 : index
    %3 = vector.load %arg3[%c0_4, %c0_5, %c0_6, %c0_7] : memref<1x1x128x3xf32, #tpu.memory_space<vmem>>, vector<1x1x4x3xf32>
    %4 = vector.shape_cast %3 : vector<1x1x4x3xf32> to vector<4x3xf32>
    %5 = vector.shape_cast %2 : vector<4x3xf32> to vector<1x1x4x3xf32>
    tpu.vector_store %arg3[%c0_4, %c0_5, %c0_6, %c0_7], %5 {strides = array<i32>} : memref<1x1x128x3xf32, #tpu.memory_space<vmem>>, vector<1x1x4x3xf32>,
    %c0_8 = arith.constant 0 : index
    %c0_9 = arith.constant 0 : index
    %c0_10 = arith.constant 0 : index
    %c8 = arith.constant 8 : index
    %c0_11 = arith.constant 0 : index
    %6 = vector.load %arg2[%c0_8, %c0_9, %c0_10, %c8, %c0_11] : memref<1x3x1x32x4xf32, #tpu.memory_space<vmem>>, vector<1x3x1x1x4xf32>
    %7 = vector.shape_cast %6 : vector<1x3x1x1x4xf32> to vector<3x4xf32>
    %8 = tpu.transpose %7, [1, 0] : vector<3x4xf32> -> vector<4x3xf32>
    %c0_12 = arith.constant 0 : index
    %c0_13 = arith.constant 0 : index
    %c4 = arith.constant 4 : index
    %c0_14 = arith.constant 0 : index
    %9 = vector.load %arg3[%c0_12, %c0_13, %c4, %c0_14] : memref<1x1x128x3xf32, #tpu.memory_space<vmem>>, vector<1x1x4x3xf32>
    %10 = vector.shape_cast %9 : vector<1x1x4x3xf32> to vector<4x3xf32>
    %11 = vector.shape_cast %8 : vector<4x3xf32> to vector<1x1x4x3xf32>
    tpu.vector_store %arg3[%c0_12, %c0_13, %c4, %c0_14], %11 {strides = array<i32>} : memref<1x1x128x3xf32, #tpu.memory_space<vmem>>, vector<1x1x4x3xf32>,
    %c0_15 = arith.constant 0 : index
    %c0_16 = arith.constant 0 : index
    %c0_17 = arith.constant 0 : index
    %c16 = arith.constant 16 : index
    %c0_18 = arith.constant 0 : index
    %12 = vector.load %arg2[%c0_15, %c0_16, %c0_17, %c16, %c0_18] : memref<1x3x1x32x4xf32, #tpu.memory_space<vmem>>, vector<1x3x1x1x4xf32>
    %13 = vector.shape_cast %12 : vector<1x3x1x1x4xf32> to vector<3x4xf32>
    %14 = tpu.transpose %13, [1, 0] : vector<3x4xf32> -> vector<4x3xf32>
    %c0_19 = arith.constant 0 : index
    %c0_20 = arith.constant 0 : index
    %c8_21 = arith.constant 8 : index
    %c0_22 = arith.constant 0 : index
    %15 = vector.load %arg3[%c0_19, %c0_20, %c8_21, %c0_22] : memref<1x1x128x3xf32, #tpu.memory_space<vmem>>, vector<1x1x4x3xf32>
    %16 = vector.shape_cast %15 : vector<1x1x4x3xf32> to vector<4x3xf32>
    %17 = vector.shape_cast %14 : vector<4x3xf32> to vector<1x1x4x3xf32>
    tpu.vector_store %arg3[%c0_19, %c0_20, %c8_21, %c0_22], %17 {strides = array<i32>} : memref<1x1x128x3xf32, #tpu.memory_space<vmem>>, vector<1x1x4x3xf32>,
    %c0_23 = arith.constant 0 : index
    %c0_24 = arith.constant 0 : index
    %c0_25 = arith.constant 0 : index
    %c24 = arith.constant 24 : index
    %c0_26 = arith.constant 0 : index
    %18 = vector.load %arg2[%c0_23, %c0_24, %c0_25, %c24, %c0_26] : memref<1x3x1x32x4xf32, #tpu.memory_space<vmem>>, vector<1x3x1x1x4xf32>
    %19 = vector.shape_cast %18 : vector<1x3x1x1x4xf32> to vector<3x4xf32>
    %20 = tpu.transpose %19, [1, 0] : vector<3x4xf32> -> vector<4x3xf32>
    %c0_27 = arith.constant 0 : index
    %c0_28 = arith.constant 0 : index
    %c12 = arith.constant 12 : index
    %c0_29 = arith.constant 0 : index
    %21 = vector.load %arg3[%c0_27, %c0_28, %c12, %c0_29] : memref<1x1x128x3xf32, #tpu.memory_space<vmem>>, vector<1x1x4x3xf32>
    %22 = vector.shape_cast %21 : vector<1x1x4x3xf32> to vector<4x3xf32>
    %23 = vector.shape_cast %20 : vector<4x3xf32> to vector<1x1x4x3xf32>
    tpu.vector_store %arg3[%c0_27, %c0_28, %c12, %c0_29], %23 {strides = array<i32>} : memref<1x1x128x3xf32, #tpu.memory_space<vmem>>, vector<1x1x4x3xf32>,
    %c0_30 = arith.constant 0 : index
    %c0_31 = arith.constant 0 : index
    %c0_32 = arith.constant 0 : index
    %c1 = arith.constant 1 : index
    %c0_33 = arith.constant 0 : index
    %24 = vector.load %arg2[%c0_30, %c0_31, %c0_32, %c1, %c0_33] : memref<1x3x1x32x4xf32, #tpu.memory_space<vmem>>, vector<1x3x1x1x4xf32>
    %25 = vector.shape_cast %24 : vector<1x3x1x1x4xf32> to vector<3x4xf32>
    %26 = tpu.transpose %25, [1, 0] : vector<3x4xf32> -> vector<4x3xf32>
    %c0_34 = arith.constant 0 : index
    %c0_35 = arith.constant 0 : index
    %c16_36 = arith.constant 16 : index
    %c0_37 = arith.constant 0 : index
    %27 = vector.load %arg3[%c0_34, %c0_35, %c16_36, %c0_37] : memref<1x1x128x3xf32, #tpu.memory_space<vmem>>, vector<1x1x4x3xf32>
    %28 = vector.shape_cast %27 : vector<1x1x4x3xf32> to vector<4x3xf32>
    %29 = vector.shape_cast %26 : vector<4x3xf32> to vector<1x1x4x3xf32>
    tpu.vector_store %arg3[%c0_34, %c0_35, %c16_36, %c0_37], %29 {strides = array<i32>} : memref<1x1x128x3xf32, #tpu.memory_space<vmem>>, vector<1x1x4x3xf32>,
    %c0_38 = arith.constant 0 : index
    %c0_39 = arith.constant 0 : index
    %c0_40 = arith.constant 0 : index
    %c9 = arith.constant 9 : index
    %c0_41 = arith.constant 0 : index
    %30 = vector.load %arg2[%c0_38, %c0_39, %c0_40, %c9, %c0_41] : memref<1x3x1x32x4xf32, #tpu.memory_space<vmem>>, vector<1x3x1x1x4xf32>
    %31 = vector.shape_cast %30 : vector<1x3x1x1x4xf32> to vector<3x4xf32>
    %32 = tpu.transpose %31, [1, 0] : vector<3x4xf32> -> vector<4x3xf32>
    %c0_42 = arith.constant 0 : index
    %c0_43 = arith.constant 0 : index
    %c20 = arith.constant 20 : index
    %c0_44 = arith.constant 0 : index
    %33 = vector.load %arg3[%c0_42, %c0_43, %c20, %c0_44] : memref<1x1x128x3xf32, #tpu.memory_space<vmem>>, vector<1x1x4x3xf32>
    %34 = vector.shape_cast %33 : vector<1x1x4x3xf32> to vector<4x3xf32>
    %35 = vector.shape_cast %32 : vector<4x3xf32> to vector<1x1x4x3xf32>
    tpu.vector_store %arg3[%c0_42, %c0_43, %c20, %c0_44], %35 {strides = array<i32>} : memref<1x1x128x3xf32, #tpu.memory_space<vmem>>, vector<1x1x4x3xf32>,
    %c0_45 = arith.constant 0 : index
    %c0_46 = arith.constant 0 : index
    %c0_47 = arith.constant 0 : index
    %c17 = arith.constant 17 : index
    %c0_48 = arith.constant 0 : index
    %36 = vector.load %arg2[%c0_45, %c0_46, %c0_47, %c17, %c0_48] : memref<1x3x1x32x4xf32, #tpu.memory_space<vmem>>, vector<1x3x1x1x4xf32>
    %37 = vector.shape_cast %36 : vector<1x3x1x1x4xf32> to vector<3x4xf32>
    %38 = tpu.transpose %37, [1, 0] : vector<3x4xf32> -> vector<4x3xf32>
    %c0_49 = arith.constant 0 : index
    %c0_50 = arith.constant 0 : index
    %c24_51 = arith.constant 24 : index
    %c0_52 = arith.constant 0 : index
    %39 = vector.load %arg3[%c0_49, %c0_50, %c24_51, %c0_52] : memref<1x1x128x3xf32, #tpu.memory_space<vmem>>, vector<1x1x4x3xf32>
    %40 = vector.shape_cast %39 : vector<1x1x4x3xf32> to vector<4x3xf32>
    %41 = vector.shape_cast %38 : vector<4x3xf32> to vector<1x1x4x3xf32>
    tpu.vector_store %arg3[%c0_49, %c0_50, %c24_51, %c0_52], %41 {strides = array<i32>} : memref<1x1x128x3xf32, #tpu.memory_space<vmem>>, vector<1x1x4x3xf32>,
    %c0_53 = arith.constant 0 : index
    %c0_54 = arith.constant 0 : index
    %c0_55 = arith.constant 0 : index
    %c25 = arith.constant 25 : index
    %c0_56 = arith.constant 0 : index
    %42 = vector.load %arg2[%c0_53, %c0_54, %c0_55, %c25, %c0_56] : memref<1x3x1x32x4xf32, #tpu.memory_space<vmem>>, vector<1x3x1x1x4xf32>
    %43 = vector.shape_cast %42 : vector<1x3x1x1x4xf32> to vector<3x4xf32>
    %44 = tpu.transpose %43, [1, 0] : vector<3x4xf32> -> vector<4x3xf32>
    %c0_57 = arith.constant 0 : index
    %c0_58 = arith.constant 0 : index
    %c28 = arith.constant 28 : index
    %c0_59 = arith.constant 0 : index
    %45 = vector.load %arg3[%c0_57, %c0_58, %c28, %c0_59] : memref<1x1x128x3xf32, #tpu.memory_space<vmem>>, vector<1x1x4x3xf32>
    %46 = vector.shape_cast %45 : vector<1x1x4x3xf32> to vector<4x3xf32>
    %47 = vector.shape_cast %44 : vector<4x3xf32> to vector<1x1x4x3xf32>
    tpu.vector_store %arg3[%c0_57, %c0_58, %c28, %c0_59], %47 {strides = array<i32>} : memref<1x1x128x3xf32, #tpu.memory_space<vmem>>, vector<1x1x4x3xf32>,
    %c0_60 = arith.constant 0 : index
    %c0_61 = arith.constant 0 : index
    %c0_62 = arith.constant 0 : index
    %c2 = arith.constant 2 : index
    %c0_63 = arith.constant 0 : index
    %48 = vector.load %arg2[%c0_60, %c0_61, %c0_62, %c2, %c0_63] : memref<1x3x1x32x4xf32, #tpu.memory_space<vmem>>, vector<1x3x1x1x4xf32>
    %49 = vector.shape_cast %48 : vector<1x3x1x1x4xf32> to vector<3x4xf32>
    %50 = tpu.transpose %49, [1, 0] : vector<3x4xf32> -> vector<4x3xf32>
    %c0_64 = arith.constant 0 : index
    %c0_65 = arith.constant 0 : index
    %c32 = arith.constant 32 : index
    %c0_66 = arith.constant 0 : index
    %51 = vector.load %arg3[%c0_64, %c0_65, %c32, %c0_66] : memref<1x1x128x3xf32, #tpu.memory_space<vmem>>, vector<1x1x4x3xf32>
    %52 = vector.shape_cast %51 : vector<1x1x4x3xf32> to vector<4x3xf32>
    %53 = vector.shape_cast %50 : vector<4x3xf32> to vector<1x1x4x3xf32>
    tpu.vector_store %arg3[%c0_64, %c0_65, %c32, %c0_66], %53 {strides = array<i32>} : memref<1x1x128x3xf32, #tpu.memory_space<vmem>>, vector<1x1x4x3xf32>,
    %c0_67 = arith.constant 0 : index
    %c0_68 = arith.constant 0 : index
    %c0_69 = arith.constant 0 : index
    %c10 = arith.constant 10 : index
    %c0_70 = arith.constant 0 : index
    %54 = vector.load %arg2[%c0_67, %c0_68, %c0_69, %c10, %c0_70] : memref<1x3x1x32x4xf32, #tpu.memory_space<vmem>>, vector<1x3x1x1x4xf32>
    %55 = vector.shape_cast %54 : vector<1x3x1x1x4xf32> to vector<3x4xf32>
    %56 = tpu.transpose %55, [1, 0] : vector<3x4xf32> -> vector<4x3xf32>
    %c0_71 = arith.constant 0 : index
    %c0_72 = arith.constant 0 : index
    %c36 = arith.constant 36 : index
    %c0_73 = arith.constant 0 : index
    %57 = vector.load %arg3[%c0_71, %c0_72, %c36, %c0_73] : memref<1x1x128x3xf32, #tpu.memory_space<vmem>>, vector<1x1x4x3xf32>
    %58 = vector.shape_cast %57 : vector<1x1x4x3xf32> to vector<4x3xf32>
    %59 = vector.shape_cast %56 : vector<4x3xf32> to vector<1x1x4x3xf32>
    tpu.vector_store %arg3[%c0_71, %c0_72, %c36, %c0_73], %59 {strides = array<i32>} : memref<1x1x128x3xf32, #tpu.memory_space<vmem>>, vector<1x1x4x3xf32>,
    %c0_74 = arith.constant 0 : index
    %c0_75 = arith.constant 0 : index
    %c0_76 = arith.constant 0 : index
    %c18 = arith.constant 18 : index
    %c0_77 = arith.constant 0 : index
    %60 = vector.load %arg2[%c0_74, %c0_75, %c0_76, %c18, %c0_77] : memref<1x3x1x32x4xf32, #tpu.memory_space<vmem>>, vector<1x3x1x1x4xf32>
    %61 = vector.shape_cast %60 : vector<1x3x1x1x4xf32> to vector<3x4xf32>
    %62 = tpu.transpose %61, [1, 0] : vector<3x4xf32> -> vector<4x3xf32>
    %c0_78 = arith.constant 0 : index
    %c0_79 = arith.constant 0 : index
    %c40 = arith.constant 40 : index
    %c0_80 = arith.constant 0 : index
    %63 = vector.load %arg3[%c0_78, %c0_79, %c40, %c0_80] : memref<1x1x128x3xf32, #tpu.memory_space<vmem>>, vector<1x1x4x3xf32>
    %64 = vector.shape_cast %63 : vector<1x1x4x3xf32> to vector<4x3xf32>
    %65 = vector.shape_cast %62 : vector<4x3xf32> to vector<1x1x4x3xf32>
    tpu.vector_store %arg3[%c0_78, %c0_79, %c40, %c0_80], %65 {strides = array<i32>} : memref<1x1x128x3xf32, #tpu.memory_space<vmem>>, vector<1x1x4x3xf32>,
    %c0_81 = arith.constant 0 : index
    %c0_82 = arith.constant 0 : index
    %c0_83 = arith.constant 0 : index
    %c26 = arith.constant 26 : index
    %c0_84 = arith.constant 0 : index
    %66 = vector.load %arg2[%c0_81, %c0_82, %c0_83, %c26, %c0_84] : memref<1x3x1x32x4xf32, #tpu.memory_space<vmem>>, vector<1x3x1x1x4xf32>
    %67 = vector.shape_cast %66 : vector<1x3x1x1x4xf32> to vector<3x4xf32>
    %68 = tpu.transpose %67, [1, 0] : vector<3x4xf32> -> vector<4x3xf32>
    %c0_85 = arith.constant 0 : index
    %c0_86 = arith.constant 0 : index
    %c44 = arith.constant 44 : index
    %c0_87 = arith.constant 0 : index
    %69 = vector.load %arg3[%c0_85, %c0_86, %c44, %c0_87] : memref<1x1x128x3xf32, #tpu.memory_space<vmem>>, vector<1x1x4x3xf32>
    %70 = vector.shape_cast %69 : vector<1x1x4x3xf32> to vector<4x3xf32>
    %71 = vector.shape_cast %68 : vector<4x3xf32> to vector<1x1x4x3xf32>
    tpu.vector_store %arg3[%c0_85, %c0_86, %c44, %c0_87], %71 {strides = array<i32>} : memref<1x1x128x3xf32, #tpu.memory_space<vmem>>, vector<1x1x4x3xf32>,
    %c0_88 = arith.constant 0 : index
    %c0_89 = arith.constant 0 : index
    %c0_90 = arith.constant 0 : index
    %c3 = arith.constant 3 : index
    %c0_91 = arith.constant 0 : index
    %72 = vector.load %arg2[%c0_88, %c0_89, %c0_90, %c3, %c0_91] : memref<1x3x1x32x4xf32, #tpu.memory_space<vmem>>, vector<1x3x1x1x4xf32>
    %73 = vector.shape_cast %72 : vector<1x3x1x1x4xf32> to vector<3x4xf32>
    %74 = tpu.transpose %73, [1, 0] : vector<3x4xf32> -> vector<4x3xf32>
    %c0_92 = arith.constant 0 : index
    %c0_93 = arith.constant 0 : index
    %c48 = arith.constant 48 : index
    %c0_94 = arith.constant 0 : index
    %75 = vector.load %arg3[%c0_92, %c0_93, %c48, %c0_94] : memref<1x1x128x3xf32, #tpu.memory_space<vmem>>, vector<1x1x4x3xf32>
    %76 = vector.shape_cast %75 : vector<1x1x4x3xf32> to vector<4x3xf32>
    %77 = vector.shape_cast %74 : vector<4x3xf32> to vector<1x1x4x3xf32>
    tpu.vector_store %arg3[%c0_92, %c0_93, %c48, %c0_94], %77 {strides = array<i32>} : memref<1x1x128x3xf32, #tpu.memory_space<vmem>>, vector<1x1x4x3xf32>,
    %c0_95 = arith.constant 0 : index
    %c0_96 = arith.constant 0 : index
    %c0_97 = arith.constant 0 : index
    %c11 = arith.constant 11 : index
    %c0_98 = arith.constant 0 : index
    %78 = vector.load %arg2[%c0_95, %c0_96, %c0_97, %c11, %c0_98] : memref<1x3x1x32x4xf32, #tpu.memory_space<vmem>>, vector<1x3x1x1x4xf32>
    %79 = vector.shape_cast %78 : vector<1x3x1x1x4xf32> to vector<3x4xf32>
    %80 = tpu.transpose %79, [1, 0] : vector<3x4xf32> -> vector<4x3xf32>
    %c0_99 = arith.constant 0 : index
    %c0_100 = arith.constant 0 : index
    %c52 = arith.constant 52 : index
    %c0_101 = arith.constant 0 : index
    %81 = vector.load %arg3[%c0_99, %c0_100, %c52, %c0_101] : memref<1x1x128x3xf32, #tpu.memory_space<vmem>>, vector<1x1x4x3xf32>
    %82 = vector.shape_cast %81 : vector<1x1x4x3xf32> to vector<4x3xf32>
    %83 = vector.shape_cast %80 : vector<4x3xf32> to vector<1x1x4x3xf32>
    tpu.vector_store %arg3[%c0_99, %c0_100, %c52, %c0_101], %83 {strides = array<i32>} : memref<1x1x128x3xf32, #tpu.memory_space<vmem>>, vector<1x1x4x3xf32>,
    %c0_102 = arith.constant 0 : index
    %c0_103 = arith.constant 0 : index
    %c0_104 = arith.constant 0 : index
    %c19 = arith.constant 19 : index
    %c0_105 = arith.constant 0 : index
    %84 = vector.load %arg2[%c0_102, %c0_103, %c0_104, %c19, %c0_105] : memref<1x3x1x32x4xf32, #tpu.memory_space<vmem>>, vector<1x3x1x1x4xf32>
    %85 = vector.shape_cast %84 : vector<1x3x1x1x4xf32> to vector<3x4xf32>
    %86 = tpu.transpose %85, [1, 0] : vector<3x4xf32> -> vector<4x3xf32>
    %c0_106 = arith.constant 0 : index
    %c0_107 = arith.constant 0 : index
    %c56 = arith.constant 56 : index
    %c0_108 = arith.constant 0 : index
    %87 = vector.load %arg3[%c0_106, %c0_107, %c56, %c0_108] : memref<1x1x128x3xf32, #tpu.memory_space<vmem>>, vector<1x1x4x3xf32>
    %88 = vector.shape_cast %87 : vector<1x1x4x3xf32> to vector<4x3xf32>
    %89 = vector.shape_cast %86 : vector<4x3xf32> to vector<1x1x4x3xf32>
    tpu.vector_store %arg3[%c0_106, %c0_107, %c56, %c0_108], %89 {strides = array<i32>} : memref<1x1x128x3xf32, #tpu.memory_space<vmem>>, vector<1x1x4x3xf32>,
    %c0_109 = arith.constant 0 : index
    %c0_110 = arith.constant 0 : index
    %c0_111 = arith.constant 0 : index
    %c27 = arith.constant 27 : index
    %c0_112 = arith.constant 0 : index
    %90 = vector.load %arg2[%c0_109, %c0_110, %c0_111, %c27, %c0_112] : memref<1x3x1x32x4xf32, #tpu.memory_space<vmem>>, vector<1x3x1x1x4xf32>
    %91 = vector.shape_cast %90 : vector<1x3x1x1x4xf32> to vector<3x4xf32>
    %92 = tpu.transpose %91, [1, 0] : vector<3x4xf32> -> vector<4x3xf32>
    %c0_113 = arith.constant 0 : index
    %c0_114 = arith.constant 0 : index
    %c60 = arith.constant 60 : index
    %c0_115 = arith.constant 0 : index
    %93 = vector.load %arg3[%c0_113, %c0_114, %c60, %c0_115] : memref<1x1x128x3xf32, #tpu.memory_space<vmem>>, vector<1x1x4x3xf32>
    %94 = vector.shape_cast %93 : vector<1x1x4x3xf32> to vector<4x3xf32>
    %95 = vector.shape_cast %92 : vector<4x3xf32> to vector<1x1x4x3xf32>
    tpu.vector_store %arg3[%c0_113, %c0_114, %c60, %c0_115], %95 {strides = array<i32>} : memref<1x1x128x3xf32, #tpu.memory_space<vmem>>, vector<1x1x4x3xf32>,
    %c0_116 = arith.constant 0 : index
    %c0_117 = arith.constant 0 : index
    %c0_118 = arith.constant 0 : index
    %c4_119 = arith.constant 4 : index
    %c0_120 = arith.constant 0 : index
    %96 = vector.load %arg2[%c0_116, %c0_117, %c0_118, %c4_119, %c0_120] : memref<1x3x1x32x4xf32, #tpu.memory_space<vmem>>, vector<1x3x1x1x4xf32>
    %97 = vector.shape_cast %96 : vector<1x3x1x1x4xf32> to vector<3x4xf32>
    %98 = tpu.transpose %97, [1, 0] : vector<3x4xf32> -> vector<4x3xf32>
    %c0_121 = arith.constant 0 : index
    %c0_122 = arith.constant 0 : index
    %c64 = arith.constant 64 : index
    %c0_123 = arith.constant 0 : index
    %99 = vector.load %arg3[%c0_121, %c0_122, %c64, %c0_123] : memref<1x1x128x3xf32, #tpu.memory_space<vmem>>, vector<1x1x4x3xf32>
    %100 = vector.shape_cast %99 : vector<1x1x4x3xf32> to vector<4x3xf32>
    %101 = vector.shape_cast %98 : vector<4x3xf32> to vector<1x1x4x3xf32>
    tpu.vector_store %arg3[%c0_121, %c0_122, %c64, %c0_123], %101 {strides = array<i32>} : memref<1x1x128x3xf32, #tpu.memory_space<vmem>>, vector<1x1x4x3xf32>,
    %c0_124 = arith.constant 0 : index
    %c0_125 = arith.constant 0 : index
    %c0_126 = arith.constant 0 : index
    %c12_127 = arith.constant 12 : index
    %c0_128 = arith.constant 0 : index
    %102 = vector.load %arg2[%c0_124, %c0_125, %c0_126, %c12_127, %c0_128] : memref<1x3x1x32x4xf32, #tpu.memory_space<vmem>>, vector<1x3x1x1x4xf32>
    %103 = vector.shape_cast %102 : vector<1x3x1x1x4xf32> to vector<3x4xf32>
    %104 = tpu.transpose %103, [1, 0] : vector<3x4xf32> -> vector<4x3xf32>
    %c0_129 = arith.constant 0 : index
    %c0_130 = arith.constant 0 : index
    %c68 = arith.constant 68 : index
    %c0_131 = arith.constant 0 : index
    %105 = vector.load %arg3[%c0_129, %c0_130, %c68, %c0_131] : memref<1x1x128x3xf32, #tpu.memory_space<vmem>>, vector<1x1x4x3xf32>
    %106 = vector.shape_cast %105 : vector<1x1x4x3xf32> to vector<4x3xf32>
    %107 = vector.shape_cast %104 : vector<4x3xf32> to vector<1x1x4x3xf32>
    tpu.vector_store %arg3[%c0_129, %c0_130, %c68, %c0_131], %107 {strides = array<i32>} : memref<1x1x128x3xf32, #tpu.memory_space<vmem>>, vector<1x1x4x3xf32>,
    %c0_132 = arith.constant 0 : index
    %c0_133 = arith.constant 0 : index
    %c0_134 = arith.constant 0 : index
    %c20_135 = arith.constant 20 : index
    %c0_136 = arith.constant 0 : index
    %108 = vector.load %arg2[%c0_132, %c0_133, %c0_134, %c20_135, %c0_136] : memref<1x3x1x32x4xf32, #tpu.memory_space<vmem>>, vector<1x3x1x1x4xf32>
    %109 = vector.shape_cast %108 : vector<1x3x1x1x4xf32> to vector<3x4xf32>
    %110 = tpu.transpose %109, [1, 0] : vector<3x4xf32> -> vector<4x3xf32>
    %c0_137 = arith.constant 0 : index
    %c0_138 = arith.constant 0 : index
    %c72 = arith.constant 72 : index
    %c0_139 = arith.constant 0 : index
    %111 = vector.load %arg3[%c0_137, %c0_138, %c72, %c0_139] : memref<1x1x128x3xf32, #tpu.memory_space<vmem>>, vector<1x1x4x3xf32>
    %112 = vector.shape_cast %111 : vector<1x1x4x3xf32> to vector<4x3xf32>
    %113 = vector.shape_cast %110 : vector<4x3xf32> to vector<1x1x4x3xf32>
    tpu.vector_store %arg3[%c0_137, %c0_138, %c72, %c0_139], %113 {strides = array<i32>} : memref<1x1x128x3xf32, #tpu.memory_space<vmem>>, vector<1x1x4x3xf32>,
    %c0_140 = arith.constant 0 : index
    %c0_141 = arith.constant 0 : index
    %c0_142 = arith.constant 0 : index
    %c28_143 = arith.constant 28 : index
    %c0_144 = arith.constant 0 : index
    %114 = vector.load %arg2[%c0_140, %c0_141, %c0_142, %c28_143, %c0_144] : memref<1x3x1x32x4xf32, #tpu.memory_space<vmem>>, vector<1x3x1x1x4xf32>
    %115 = vector.shape_cast %114 : vector<1x3x1x1x4xf32> to vector<3x4xf32>
    %116 = tpu.transpose %115, [1, 0] : vector<3x4xf32> -> vector<4x3xf32>
    %c0_145 = arith.constant 0 : index
    %c0_146 = arith.constant 0 : index
    %c76 = arith.constant 76 : index
    %c0_147 = arith.constant 0 : index
    %117 = vector.load %arg3[%c0_145, %c0_146, %c76, %c0_147] : memref<1x1x128x3xf32, #tpu.memory_space<vmem>>, vector<1x1x4x3xf32>
    %118 = vector.shape_cast %117 : vector<1x1x4x3xf32> to vector<4x3xf32>
    %119 = vector.shape_cast %116 : vector<4x3xf32> to vector<1x1x4x3xf32>
    tpu.vector_store %arg3[%c0_145, %c0_146, %c76, %c0_147], %119 {strides = array<i32>} : memref<1x1x128x3xf32, #tpu.memory_space<vmem>>, vector<1x1x4x3xf32>,
    %c0_148 = arith.constant 0 : index
    %c0_149 = arith.constant 0 : index
    %c0_150 = arith.constant 0 : index
    %c5 = arith.constant 5 : index
    %c0_151 = arith.constant 0 : index
    %120 = vector.load %arg2[%c0_148, %c0_149, %c0_150, %c5, %c0_151] : memref<1x3x1x32x4xf32, #tpu.memory_space<vmem>>, vector<1x3x1x1x4xf32>
    %121 = vector.shape_cast %120 : vector<1x3x1x1x4xf32> to vector<3x4xf32>
    %122 = tpu.transpose %121, [1, 0] : vector<3x4xf32> -> vector<4x3xf32>
    %c0_152 = arith.constant 0 : index
    %c0_153 = arith.constant 0 : index
    %c80 = arith.constant 80 : index
    %c0_154 = arith.constant 0 : index
    %123 = vector.load %arg3[%c0_152, %c0_153, %c80, %c0_154] : memref<1x1x128x3xf32, #tpu.memory_space<vmem>>, vector<1x1x4x3xf32>
    %124 = vector.shape_cast %123 : vector<1x1x4x3xf32> to vector<4x3xf32>
    %125 = vector.shape_cast %122 : vector<4x3xf32> to vector<1x1x4x3xf32>
    tpu.vector_store %arg3[%c0_152, %c0_153, %c80, %c0_154], %125 {strides = array<i32>} : memref<1x1x128x3xf32, #tpu.memory_space<vmem>>, vector<1x1x4x3xf32>,
    %c0_155 = arith.constant 0 : index
    %c0_156 = arith.constant 0 : index
    %c0_157 = arith.constant 0 : index
    %c13 = arith.constant 13 : index
    %c0_158 = arith.constant 0 : index
    %126 = vector.load %arg2[%c0_155, %c0_156, %c0_157, %c13, %c0_158] : memref<1x3x1x32x4xf32, #tpu.memory_space<vmem>>, vector<1x3x1x1x4xf32>
    %127 = vector.shape_cast %126 : vector<1x3x1x1x4xf32> to vector<3x4xf32>
    %128 = tpu.transpose %127, [1, 0] : vector<3x4xf32> -> vector<4x3xf32>
    %c0_159 = arith.constant 0 : index
    %c0_160 = arith.constant 0 : index
    %c84 = arith.constant 84 : index
    %c0_161 = arith.constant 0 : index
    %129 = vector.load %arg3[%c0_159, %c0_160, %c84, %c0_161] : memref<1x1x128x3xf32, #tpu.memory_space<vmem>>, vector<1x1x4x3xf32>
    %130 = vector.shape_cast %129 : vector<1x1x4x3xf32> to vector<4x3xf32>
    %131 = vector.shape_cast %128 : vector<4x3xf32> to vector<1x1x4x3xf32>
    tpu.vector_store %arg3[%c0_159, %c0_160, %c84, %c0_161], %131 {strides = array<i32>} : memref<1x1x128x3xf32, #tpu.memory_space<vmem>>, vector<1x1x4x3xf32>,
    %c0_162 = arith.constant 0 : index
    %c0_163 = arith.constant 0 : index
    %c0_164 = arith.constant 0 : index
    %c21 = arith.constant 21 : index
    %c0_165 = arith.constant 0 : index
    %132 = vector.load %arg2[%c0_162, %c0_163, %c0_164, %c21, %c0_165] : memref<1x3x1x32x4xf32, #tpu.memory_space<vmem>>, vector<1x3x1x1x4xf32>
    %133 = vector.shape_cast %132 : vector<1x3x1x1x4xf32> to vector<3x4xf32>
    %134 = tpu.transpose %133, [1, 0] : vector<3x4xf32> -> vector<4x3xf32>
    %c0_166 = arith.constant 0 : index
    %c0_167 = arith.constant 0 : index
    %c88 = arith.constant 88 : index
    %c0_168 = arith.constant 0 : index
    %135 = vector.load %arg3[%c0_166, %c0_167, %c88, %c0_168] : memref<1x1x128x3xf32, #tpu.memory_space<vmem>>, vector<1x1x4x3xf32>
    %136 = vector.shape_cast %135 : vector<1x1x4x3xf32> to vector<4x3xf32>
    %137 = vector.shape_cast %134 : vector<4x3xf32> to vector<1x1x4x3xf32>
    tpu.vector_store %arg3[%c0_166, %c0_167, %c88, %c0_168], %137 {strides = array<i32>} : memref<1x1x128x3xf32, #tpu.memory_space<vmem>>, vector<1x1x4x3xf32>,
    %c0_169 = arith.constant 0 : index
    %c0_170 = arith.constant 0 : index
    %c0_171 = arith.constant 0 : index
    %c29 = arith.constant 29 : index
    %c0_172 = arith.constant 0 : index
    %138 = vector.load %arg2[%c0_169, %c0_170, %c0_171, %c29, %c0_172] : memref<1x3x1x32x4xf32, #tpu.memory_space<vmem>>, vector<1x3x1x1x4xf32>
    %139 = vector.shape_cast %138 : vector<1x3x1x1x4xf32> to vector<3x4xf32>
    %140 = tpu.transpose %139, [1, 0] : vector<3x4xf32> -> vector<4x3xf32>
    %c0_173 = arith.constant 0 : index
    %c0_174 = arith.constant 0 : index
    %c92 = arith.constant 92 : index
    %c0_175 = arith.constant 0 : index
    %141 = vector.load %arg3[%c0_173, %c0_174, %c92, %c0_175] : memref<1x1x128x3xf32, #tpu.memory_space<vmem>>, vector<1x1x4x3xf32>
    %142 = vector.shape_cast %141 : vector<1x1x4x3xf32> to vector<4x3xf32>
    %143 = vector.shape_cast %140 : vector<4x3xf32> to vector<1x1x4x3xf32>
    tpu.vector_store %arg3[%c0_173, %c0_174, %c92, %c0_175], %143 {strides = array<i32>} : memref<1x1x128x3xf32, #tpu.memory_space<vmem>>, vector<1x1x4x3xf32>,
    %c0_176 = arith.constant 0 : index
    %c0_177 = arith.constant 0 : index
    %c0_178 = arith.constant 0 : index
    %c6 = arith.constant 6 : index
    %c0_179 = arith.constant 0 : index
    %144 = vector.load %arg2[%c0_176, %c0_177, %c0_178, %c6, %c0_179] : memref<1x3x1x32x4xf32, #tpu.memory_space<vmem>>, vector<1x3x1x1x4xf32>
    %145 = vector.shape_cast %144 : vector<1x3x1x1x4xf32> to vector<3x4xf32>
    %146 = tpu.transpose %145, [1, 0] : vector<3x4xf32> -> vector<4x3xf32>
    %c0_180 = arith.constant 0 : index
    %c0_181 = arith.constant 0 : index
    %c96 = arith.constant 96 : index
    %c0_182 = arith.constant 0 : index
    %147 = vector.load %arg3[%c0_180, %c0_181, %c96, %c0_182] : memref<1x1x128x3xf32, #tpu.memory_space<vmem>>, vector<1x1x4x3xf32>
    %148 = vector.shape_cast %147 : vector<1x1x4x3xf32> to vector<4x3xf32>
    %149 = vector.shape_cast %146 : vector<4x3xf32> to vector<1x1x4x3xf32>
    tpu.vector_store %arg3[%c0_180, %c0_181, %c96, %c0_182], %149 {strides = array<i32>} : memref<1x1x128x3xf32, #tpu.memory_space<vmem>>, vector<1x1x4x3xf32>,
    %c0_183 = arith.constant 0 : index
    %c0_184 = arith.constant 0 : index
    %c0_185 = arith.constant 0 : index
    %c14 = arith.constant 14 : index
    %c0_186 = arith.constant 0 : index
    %150 = vector.load %arg2[%c0_183, %c0_184, %c0_185, %c14, %c0_186] : memref<1x3x1x32x4xf32, #tpu.memory_space<vmem>>, vector<1x3x1x1x4xf32>
    %151 = vector.shape_cast %150 : vector<1x3x1x1x4xf32> to vector<3x4xf32>
    %152 = tpu.transpose %151, [1, 0] : vector<3x4xf32> -> vector<4x3xf32>
    %c0_187 = arith.constant 0 : index
    %c0_188 = arith.constant 0 : index
    %c100 = arith.constant 100 : index
    %c0_189 = arith.constant 0 : index
    %153 = vector.load %arg3[%c0_187, %c0_188, %c100, %c0_189] : memref<1x1x128x3xf32, #tpu.memory_space<vmem>>, vector<1x1x4x3xf32>
    %154 = vector.shape_cast %153 : vector<1x1x4x3xf32> to vector<4x3xf32>
    %155 = vector.shape_cast %152 : vector<4x3xf32> to vector<1x1x4x3xf32>
    tpu.vector_store %arg3[%c0_187, %c0_188, %c100, %c0_189], %155 {strides = array<i32>} : memref<1x1x128x3xf32, #tpu.memory_space<vmem>>, vector<1x1x4x3xf32>,
    %c0_190 = arith.constant 0 : index
    %c0_191 = arith.constant 0 : index
    %c0_192 = arith.constant 0 : index
    %c22 = arith.constant 22 : index
    %c0_193 = arith.constant 0 : index
    %156 = vector.load %arg2[%c0_190, %c0_191, %c0_192, %c22, %c0_193] : memref<1x3x1x32x4xf32, #tpu.memory_space<vmem>>, vector<1x3x1x1x4xf32>
    %157 = vector.shape_cast %156 : vector<1x3x1x1x4xf32> to vector<3x4xf32>
    %158 = tpu.transpose %157, [1, 0] : vector<3x4xf32> -> vector<4x3xf32>
    %c0_194 = arith.constant 0 : index
    %c0_195 = arith.constant 0 : index
    %c104 = arith.constant 104 : index
    %c0_196 = arith.constant 0 : index
    %159 = vector.load %arg3[%c0_194, %c0_195, %c104, %c0_196] : memref<1x1x128x3xf32, #tpu.memory_space<vmem>>, vector<1x1x4x3xf32>
    %160 = vector.shape_cast %159 : vector<1x1x4x3xf32> to vector<4x3xf32>
    %161 = vector.shape_cast %158 : vector<4x3xf32> to vector<1x1x4x3xf32>
    tpu.vector_store %arg3[%c0_194, %c0_195, %c104, %c0_196], %161 {strides = array<i32>} : memref<1x1x128x3xf32, #tpu.memory_space<vmem>>, vector<1x1x4x3xf32>,
    %c0_197 = arith.constant 0 : index
    %c0_198 = arith.constant 0 : index
    %c0_199 = arith.constant 0 : index
    %c30 = arith.constant 30 : index
    %c0_200 = arith.constant 0 : index
    %162 = vector.load %arg2[%c0_197, %c0_198, %c0_199, %c30, %c0_200] : memref<1x3x1x32x4xf32, #tpu.memory_space<vmem>>, vector<1x3x1x1x4xf32>
    %163 = vector.shape_cast %162 : vector<1x3x1x1x4xf32> to vector<3x4xf32>
    %164 = tpu.transpose %163, [1, 0] : vector<3x4xf32> -> vector<4x3xf32>
    %c0_201 = arith.constant 0 : index
    %c0_202 = arith.constant 0 : index
    %c108 = arith.constant 108 : index
    %c0_203 = arith.constant 0 : index
    %165 = vector.load %arg3[%c0_201, %c0_202, %c108, %c0_203] : memref<1x1x128x3xf32, #tpu.memory_space<vmem>>, vector<1x1x4x3xf32>
    %166 = vector.shape_cast %165 : vector<1x1x4x3xf32> to vector<4x3xf32>
    %167 = vector.shape_cast %164 : vector<4x3xf32> to vector<1x1x4x3xf32>
    tpu.vector_store %arg3[%c0_201, %c0_202, %c108, %c0_203], %167 {strides = array<i32>} : memref<1x1x128x3xf32, #tpu.memory_space<vmem>>, vector<1x1x4x3xf32>,
    %c0_204 = arith.constant 0 : index
    %c0_205 = arith.constant 0 : index
    %c0_206 = arith.constant 0 : index
    %c7 = arith.constant 7 : index
    %c0_207 = arith.constant 0 : index
    %168 = vector.load %arg2[%c0_204, %c0_205, %c0_206, %c7, %c0_207] : memref<1x3x1x32x4xf32, #tpu.memory_space<vmem>>, vector<1x3x1x1x4xf32>
    %169 = vector.shape_cast %168 : vector<1x3x1x1x4xf32> to vector<3x4xf32>
    %170 = tpu.transpose %169, [1, 0] : vector<3x4xf32> -> vector<4x3xf32>
    %c0_208 = arith.constant 0 : index
    %c0_209 = arith.constant 0 : index
    %c112 = arith.constant 112 : index
    %c0_210 = arith.constant 0 : index
    %171 = vector.load %arg3[%c0_208, %c0_209, %c112, %c0_210] : memref<1x1x128x3xf32, #tpu.memory_space<vmem>>, vector<1x1x4x3xf32>
    %172 = vector.shape_cast %171 : vector<1x1x4x3xf32> to vector<4x3xf32>
    %173 = vector.shape_cast %170 : vector<4x3xf32> to vector<1x1x4x3xf32>
    tpu.vector_store %arg3[%c0_208, %c0_209, %c112, %c0_210], %173 {strides = array<i32>} : memref<1x1x128x3xf32, #tpu.memory_space<vmem>>, vector<1x1x4x3xf32>,
    %c0_211 = arith.constant 0 : index
    %c0_212 = arith.constant 0 : index
    %c0_213 = arith.constant 0 : index
    %c15 = arith.constant 15 : index
    %c0_214 = arith.constant 0 : index
    %174 = vector.load %arg2[%c0_211, %c0_212, %c0_213, %c15, %c0_214] : memref<1x3x1x32x4xf32, #tpu.memory_space<vmem>>, vector<1x3x1x1x4xf32>
    %175 = vector.shape_cast %174 : vector<1x3x1x1x4xf32> to vector<3x4xf32>
    %176 = tpu.transpose %175, [1, 0] : vector<3x4xf32> -> vector<4x3xf32>
    %c0_215 = arith.constant 0 : index
    %c0_216 = arith.constant 0 : index
    %c116 = arith.constant 116 : index
    %c0_217 = arith.constant 0 : index
    %177 = vector.load %arg3[%c0_215, %c0_216, %c116, %c0_217] : memref<1x1x128x3xf32, #tpu.memory_space<vmem>>, vector<1x1x4x3xf32>
    %178 = vector.shape_cast %177 : vector<1x1x4x3xf32> to vector<4x3xf32>
    %179 = vector.shape_cast %176 : vector<4x3xf32> to vector<1x1x4x3xf32>
    tpu.vector_store %arg3[%c0_215, %c0_216, %c116, %c0_217], %179 {strides = array<i32>} : memref<1x1x128x3xf32, #tpu.memory_space<vmem>>, vector<1x1x4x3xf32>,
    %c0_218 = arith.constant 0 : index
    %c0_219 = arith.constant 0 : index
    %c0_220 = arith.constant 0 : index
    %c23 = arith.constant 23 : index
    %c0_221 = arith.constant 0 : index
    %180 = vector.load %arg2[%c0_218, %c0_219, %c0_220, %c23, %c0_221] : memref<1x3x1x32x4xf32, #tpu.memory_space<vmem>>, vector<1x3x1x1x4xf32>
    %181 = vector.shape_cast %180 : vector<1x3x1x1x4xf32> to vector<3x4xf32>
    %182 = tpu.transpose %181, [1, 0] : vector<3x4xf32> -> vector<4x3xf32>
    %c0_222 = arith.constant 0 : index
    %c0_223 = arith.constant 0 : index
    %c120 = arith.constant 120 : index
    %c0_224 = arith.constant 0 : index
    %183 = vector.load %arg3[%c0_222, %c0_223, %c120, %c0_224] : memref<1x1x128x3xf32, #tpu.memory_space<vmem>>, vector<1x1x4x3xf32>
    %184 = vector.shape_cast %183 : vector<1x1x4x3xf32> to vector<4x3xf32>
    %185 = vector.shape_cast %182 : vector<4x3xf32> to vector<1x1x4x3xf32>
    tpu.vector_store %arg3[%c0_222, %c0_223, %c120, %c0_224], %185 {strides = array<i32>} : memref<1x1x128x3xf32, #tpu.memory_space<vmem>>, vector<1x1x4x3xf32>,
    %c0_225 = arith.constant 0 : index
    %c0_226 = arith.constant 0 : index
    %c0_227 = arith.constant 0 : index
    %c31 = arith.constant 31 : index
    %c0_228 = arith.constant 0 : index
    %186 = vector.load %arg2[%c0_225, %c0_226, %c0_227, %c31, %c0_228] : memref<1x3x1x32x4xf32, #tpu.memory_space<vmem>>, vector<1x3x1x1x4xf32>
    %187 = vector.shape_cast %186 : vector<1x3x1x1x4xf32> to vector<3x4xf32>
    %188 = tpu.transpose %187, [1, 0] : vector<3x4xf32> -> vector<4x3xf32>
    %c0_229 = arith.constant 0 : index
    %c0_230 = arith.constant 0 : index
    %c124 = arith.constant 124 : index
    %c0_231 = arith.constant 0 : index
    %189 = vector.load %arg3[%c0_229, %c0_230, %c124, %c0_231] : memref<1x1x128x3xf32, #tpu.memory_space<vmem>>, vector<1x1x4x3xf32>
    %190 = vector.shape_cast %189 : vector<1x1x4x3xf32> to vector<4x3xf32>
    %191 = vector.shape_cast %188 : vector<4x3xf32> to vector<1x1x4x3xf32>
    tpu.vector_store %arg3[%c0_229, %c0_230, %c124, %c0_231], %191 {strides = array<i32>} : memref<1x1x128x3xf32, #tpu.memory_space<vmem>>, vector<1x1x4x3xf32>,
    return
  }
  func.func @transform_0(%arg0: i32, %arg1: i32) -> (i32, i32, i32, i32, i32) {
    %c0_i32 = arith.constant 0 : i32
    %c0_i32_0 = arith.constant 0 : i32
    %c0_i32_1 = arith.constant 0 : i32
    %c0_i32_2 = arith.constant 0 : i32
    return %arg0, %c0_i32, %arg1, %c0_i32_0, %c0_i32_1 : i32, i32, i32, i32, i32
  }
  func.func @transform_1(%arg0: i32, %arg1: i32) -> (i32, i32, i32, i32) {
    %c0_i32 = arith.constant 0 : i32
    %c0_i32_0 = arith.constant 0 : i32
    %c0_i32_1 = arith.constant 0 : i32
    return %arg0, %arg1, %c0_i32, %c0_i32_0 : i32, i32, i32, i32
  }
}

</mosaic_0001>

<bundles_post_ra>
// kernel: tpu_custom_call.1
= control target key start
LH: loop header
LB: loop body
LE: loop exit
PB: predicated region body
PF: predicated region fallthrough
CT: control target
= control target key end

     0   :  { %s1866_s6 = smov 0   ;;  %s1868_s7 = smov 0   ;;  %s2185_s0 = inlined_call_operand.vmem [shape: f32[2,3,8,32,4], index: 0, kind: input, shape index: {}]   ;;  %s2186_s1 = inlined_call_operand.vmem [shape: f32[2,8,128,3], index: 1, kind: output, shape index: {}]  }
   0x1   :  { %s1870_s8 = smov 0   ;;  %s1872_s9 = smov 0  }
   0x2   :  { %s1874_s10 = smov 0   ;;  %s1876_s11 = smov 0  }
   0x3   :  { %s1878_s12 = smov 0  }
   0x4 LB: > { %s20_s13 = sadd.s32 1, %s1846_s10  ;;  %s23_s14 = sadd.s32 1, %s1850_s11  ;;  %s1854_s12 = sphi %s1878_s12, %s11_s12   ;;  %s1850_s11 = sphi %s1876_s11, %s2192_s11   ;;  %s1846_s10 = sphi %s1874_s10, %s2191_s10   ;;  %s1842_s9 = sphi %s1872_s9, %s2190_s9   ;;  %s1838_s8 = sphi %s1870_s8, %s2189_s8   ;;  %s1834_s7 = sphi %s1868_s7, %s2188_s7   ;;  %s1830_s6 = sphi %s1866_s6, %s2187_s6  }
   0x5   : > { %p21_p0 = scmp.ge.s32.totalorder %s20_s13, 8  ;;  %p39_p1 = scmp.ne.s32.totalorder %s1834_s7, %s1830_s6 }
   0x6   : > { %p40_p2 = scmp.eq.s32.totalorder %s1854_s12, 0  ;;  %s32_s18 = sadd.s32 1, %s1834_s7 }
   0x7   : > { %s2194_s13 = smov (%p21_p0, %s20_s13), 0  ;;  %s2196_s14 = smov (!%p21_p0, %s23_s14), %s1850_s11 }
   0x8   : > { %p41_p3 = por %p40_p2, %p39_p1  ;;  %p25_p4 = scmp.ge.s32.totalorder %s2196_s14, 2 }
   0x9   : > { %s28_s15 = ssub.s32 %s1846_s10, %s2194_s13  ;;  %p1731_p6 = scmp.ge.s32.totalorder %s1854_s12, 16 }
   0xa   : > { %s2198_s14 = smov (%p25_p4, %s2196_s14), 0 }
   0xb   : > { %s27_s16 = ssub.s32 %s1850_s11, %s2198_s14  ;;  %93 = sbr.rel (%p1731_p6) target bundleno = 32 (0x20), region = 16 }
   0xc   : > { %s29_s17 = sor.u32 %s28_s15, %s27_s16 }
   0xd   : > { %p30_p5 = scmp.eq.s32.totalorder %s29_s17, 0 }
   0xf   : > { %s1917_s19 = scalar_select %p30_p5, %s1834_s7, %s32_s18  }
  0x12   : > { %96 = sbr.rel (!%p41_p3) target bundleno = 32 (0x20), region = 20  ;;  %s98_s20 = sand.u32 (%p41_p3), 1, %s1834_s7  }
  0x13   : > { %s1740_s21 = smul.u32 (%p41_p3), 96, %s98_s20  ;;  %s1732_s22 = sshll.u32 (%p41_p3), %s1846_s10, 2 }
  0x14   : > { %s1741_s23 = smul.u32 (%p41_p3), 96, %s1850_s11 }
  0x15   : > { %s100_s29 = scalar_lea.vmem (%p41_p3), [#allocation2], %s1740_s21 }
  0x16   : > { %s103_s24 = sadd.s32 (%p41_p3), %s1741_s23, %s1732_s22 }
  0x17   : > { %s1733_s25 = sshll.u32 (%p41_p3), %s103_s24, 3 }
  0x18   : > { %s105_s28 = scalar_lea.vmem (%p41_p3), %s2185_s0, %s1733_s25 }
  0x19   : > { %v155_v0 = vld [vmem:[%s105_s28] sm:$0xff]  ;;  %v157_v1 = vld [vmem:[%s105_s28 + $0x8] sm:$0xff]  ;;  %v159_v2 = vld [vmem:[%s105_s28 + $0x10] sm:$0xff] }
  0x1a   : > { %156 = vst [vmem:[%s100_s29] sm:$0xff] %v155_v0  ;;  %158 = vst [vmem:[%s100_s29 + $0x8] sm:$0xff] %v157_v1  ;;  %v161_v3 = vld [vmem:[%s105_s28 + $0x18] sm:$0xff]  ;;  %v163_v4 = vld [vmem:[%s105_s28 + $0x100] sm:$0xff] }
  0x1b   : > { %160 = vst [vmem:[%s100_s29 + $0x10] sm:$0xff] %v159_v2  ;;  %v165_v5 = vld [vmem:[%s105_s28 + $0x108] sm:$0xff]  ;;  %162 = vst [vmem:[%s100_s29 + $0x18] sm:$0xff] %v161_v3  ;;  %v167_v6 = vld [vmem:[%s105_s28 + $0x110] sm:$0xff] }
  0x1c   : > { %164 = vst [vmem:[%s100_s29 + $0x20] sm:$0xff] %v163_v4  ;;  %166 = vst [vmem:[%s100_s29 + $0x28] sm:$0xff] %v165_v5  ;;  %v169_v7 = vld [vmem:[%s105_s28 + $0x118] sm:$0xff]  ;;  %v171_v8 = vld [vmem:[%s105_s28 + $0x200] sm:$0xff] }
  0x1d   : > { %168 = vst [vmem:[%s100_s29 + $0x30] sm:$0xff] %v167_v6  ;;  %170 = vst [vmem:[%s100_s29 + $0x38] sm:$0xff] %v169_v7  ;;  %v173_v9 = vld [vmem:[%s105_s28 + $0x208] sm:$0xff]  ;;  %v175_v10 = vld [vmem:[%s105_s28 + $0x210] sm:$0xff] }
  0x1e   : > { %172 = vst [vmem:[%s100_s29 + $0x40] sm:$0xff] %v171_v8  ;;  %v177_v11 = vld [vmem:[%s105_s28 + $0x218] sm:$0xff]  ;;  %174 = vst [vmem:[%s100_s29 + $0x48] sm:$0xff] %v173_v9 }
  0x1f   : > { %176 = vst [vmem:[%s100_s29 + $0x50] sm:$0xff] %v175_v10  ;;  %178 = vst [vmem:[%s100_s29 + $0x58] sm:$0xff] %v177_v11 }
  0x20 PF: > { %p1734_p7 = scmp.ge.s32.totalorder %s1854_s12, 1  ;;  %p183_p8 = scmp.lt.s32.totalorder %s1854_s12, 17 }
  0x22   : > { %p184_p9 = pnand %p1734_p7, %p183_p8 }
  0x23   : > { %s190_s30 = sand.u32 (!%p184_p9), 1, %s1830_s6   ;;  %vm229_vm0 = vcmask (!%p184_p9), 1041409   ;;  %vm232_vm1 = vcmask (!%p184_p9), 1042434   ;;  %p213_p10 = scmp.lt.s32.totalorder (!%p184_p9), %s1842_s9, 1  ;;  %vm267_vm2 = vcmask (!%p184_p9), 19456  }
  0x24   : > { %187 = sbr.rel (%p184_p9) target bundleno = 236 (0xec), region = 58  ;;  %p215_p11 = scmp.lt.s32.totalorder (!%p184_p9), %s1838_s8, 7 }
  0x25   : > { %s1742_s2 = smul.u32 (!%p184_p9), 96, %s190_s30 }
  0x27   : > { %s1929_s3 = scalar_lea.vmem (!%p184_p9), [#allocation2], %s1742_s2 }
  0x28   : > { %v313_v12 = vld [vmem:[%s1929_s3 + $0x10] sm:$0x1] (!%p184_p9)  ;;  %v222_v17 = vld [vmem:[%s1929_s3] sm:$0x1] (!%p184_p9)  ;;  %v357_v21 = vld [vmem:[%s1929_s3 + $0x18] sm:$0x1] (!%p184_p9) }
  0x29   : > { %v314_v13 = vld [vmem:[%s1929_s3 + $0x30] sm:$0x1] (!%p184_p9)  ;;  %v223_v18 = vld [vmem:[%s1929_s3 + $0x20] sm:$0x1] (!%p184_p9)  ;;  %v358_v24 = vld [vmem:[%s1929_s3 + $0x38] sm:$0x1] (!%p184_p9) }
  0x2a   : > { %v315_v14 = vld [vmem:[%s1929_s3 + $0x50] sm:$0x1] (!%p184_p9)  ;;  %v319_v15 = vrot.slane (!%p184_p9), %v314_v13, 7  ;;  %v224_v19 = vld [vmem:[%s1929_s3 + $0x40] sm:$0x1] (!%p184_p9)  ;;  %v228_v20 = vrot.slane (!%p184_p9), %v223_v18, 7 }
  0x2b   : > { %v321_v16 = vrot.slane %v315_v14, 6  ;;  %v231_v23 = vrot.slane %v224_v19, 6  ;;  %v359_v25 = vld [vmem:[%s1929_s3 + $0x58] sm:$0x1]  ;;  %v363_v28 = vrot.slane %v358_v24, 7  ;;  %s2200_s9 = smov (!%p213_p10, %s1842_s9), 1 }
  0x2c   : > { %v320_v22 = vsel %vm229_vm0, %v319_v15, %v313_v12  ;;  %v230_v27 = vsel %vm229_vm0, %v228_v20, %v222_v17  ;;  %v365_v29 = vrot.slane %v359_v25, 6  ;;  %v269_v30 = vld [vmem:[%s1929_s3 + $0x8] sm:$0x1]  ;;  %v445_v35 = vld [vmem:[%s1929_s3 + $0x9] sm:$0x1]  ;;  %s2202_s8 = smov (!%p215_p11, %s1838_s8), 7 }
  0x2d   : > { %v322_v26 = vsel %vm232_vm1, %v321_v16, %v320_v22  ;;  %v270_v31 = vld [vmem:[%s1929_s3 + $0x28] sm:$0x1]  ;;  %v233_v32 = vsel %vm232_vm1, %v231_v23, %v230_v27  ;;  %v364_v36 = vsel %vm229_vm0, %v363_v28, %v357_v21  ;;  %v446_v38 = vld [vmem:[%s1929_s3 + $0x29] sm:$0x1]  ;;  %v401_v44 = vld [vmem:[%s1929_s3 + $0x1] sm:$0x1] }
  0x2e   : > { %324 = vxpose.xlu1.b32.start.end [1/1] (short) (narrow) %v322_v26, 8  ;;  %v271_v33 = vld [vmem:[%s1929_s3 + $0x48] sm:$0x1]  ;;  %v275_v34 = vrot.slane %v270_v31, 7  ;;  %235 = vxpose.xlu0.b32.start.end [1/1] (short) (narrow) %v233_v32, 8  ;;  %v366_v40 = vsel %vm232_vm1, %v365_v29, %v364_v36  ;;  %v451_v42 = vrot.slane %v446_v38, 7 }
  0x2f   : > { %v277_v37 = vrot.slane %v271_v33, 6  ;;  %v447_v39 = vld [vmem:[%s1929_s3 + $0x49] sm:$0x1]  ;;  %v402_v45 = vld [vmem:[%s1929_s3 + $0x21] sm:$0x1]  ;;  %s1735_s4 = sshll.u32 %s2202_s8, 4 }
  0x30   : > { %v276_v41 = vsel %vm229_vm0, %v275_v34, %v269_v30  ;;  %v453_v43 = vrot.slane %v447_v39, 6  ;;  %v403_v47 = vld [vmem:[%s1929_s3 + $0x41] sm:$0x1]  ;;  %v407_v48 = vrot.slane %v402_v45, 7  ;;  %v533_v49 = vld [vmem:[%s1929_s3 + $0x19] sm:$0x1]  ;;  %v452_v50 = vsel %vm229_vm0, %v451_v42, %v445_v35 }
  0x31   : > { %v278_v46 = vsel %vm232_vm1, %v277_v37, %v276_v41  ;;  %v409_v51 = vrot.slane %v403_v47, 6  ;;  %v534_v52 = vld [vmem:[%s1929_s3 + $0x39] sm:$0x1]  ;;  %v489_v58 = vld [vmem:[%s1929_s3 + $0x11] sm:$0x1]  ;;  %s1736_s5 = sshll.u32 %s2200_s9, 7 }
  0x32   : > { %368 = vxpose.xlu1.b32.start.end [1/1] (short) (narrow) %v366_v40, 8  ;;  %v535_v53 = vld [vmem:[%s1929_s3 + $0x59] sm:$0x1]  ;;  %280 = vxpose.xlu0.b32.start.end [1/1] (short) (narrow) %v278_v46, 8  ;;  %v454_v54 = vsel %vm232_vm1, %v453_v43, %v452_v50  ;;  %v408_v55 = vsel %vm229_vm0, %v407_v48, %v401_v44  ;;  %v539_v56 = vrot.slane %v534_v52, 7  ;;  %s219_s6 = sadd.s32 %s1736_s5, %s1735_s4 }
  0x33   : > { %v541_v57 = vrot.slane %v535_v53, 6  ;;  %v410_v59 = vsel %vm232_vm1, %v409_v51, %v408_v55  ;;  %v490_v60 = vld [vmem:[%s1929_s3 + $0x31] sm:$0x1]  ;;  %v621_v62 = vld [vmem:[%s1929_s3 + $0xa] sm:$0x1]  ;;  %s1737_s15 = sshll.u32 %s219_s6, 3 }
  0x34   : > { %v491_v61 = vld [vmem:[%s1929_s3 + $0x51] sm:$0x1]  ;;  %v540_v63 = vsel %vm229_vm0, %v539_v56, %v533_v49  ;;  %v495_v0 = vrot.slane %v490_v60, 7  ;;  %v622_v2 = vld [vmem:[%s1929_s3 + $0x2a] sm:$0x1]  ;;  %s2098_s18 = scalar_lea.vmem %s2186_s1, %s1737_s15 }
  0x35   : > { %v497_v1 = vrot.slane %v491_v61, 6  ;;  %v623_v3 = vld [vmem:[%s1929_s3 + $0x4a] sm:$0x1]  ;;  %v627_v4 = vrot.slane %v622_v2, 7  ;;  %v577_v5 = vld [vmem:[%s1929_s3 + $0x2] sm:$0x1]  ;;  %v542_v6 = vsel %vm232_vm1, %v541_v57, %v540_v63 }
  0x36   : > { %456 = vxpose.xlu1.b32.start.end [1/1] (short) (narrow) %v454_v54, 8  ;;  %412 = vxpose.xlu0.b32.start.end [1/1] (short) (narrow) %v410_v59, 8  ;;  %v496_v7 = vsel %vm229_vm0, %v495_v0, %v489_v58  ;;  %v629_v8 = vrot.slane %v623_v3, 6  ;;  %v578_v9 = vld [vmem:[%s1929_s3 + $0x22] sm:$0x1] }
  0x37   : > { %v579_v10 = vld [vmem:[%s1929_s3 + $0x42] sm:$0x1]  ;;  %v498_v11 = vsel %vm232_vm1, %v497_v1, %v496_v7  ;;  %v628_v12 = vsel %vm229_vm0, %v627_v4, %v621_v62  ;;  %v583_v13 = vrot.slane %v578_v9, 7  ;;  %v709_v15 = vld [vmem:[%s1929_s3 + $0x1a] sm:$0x1] }
  0x38   : > { %v585_v14 = vrot.slane %v579_v10, 6  ;;  %v710_v16 = vld [vmem:[%s1929_s3 + $0x3a] sm:$0x1]  ;;  %v665_v19 = vld [vmem:[%s1929_s3 + $0x12] sm:$0x1]  ;;  %v630_v23 = vsel %vm232_vm1, %v629_v8, %v628_v12 }
  0x39   : > { %v711_v17 = vld [vmem:[%s1929_s3 + $0x5a] sm:$0x1]  ;;  %v715_v18 = vrot.slane %v710_v16, 7  ;;  %v584_v20 = vsel %vm229_vm0, %v583_v13, %v577_v5  ;;  %v666_v21 = vld [vmem:[%s1929_s3 + $0x32] sm:$0x1] }
  0x3a   : > { %544 = vxpose.xlu1.b32.start.end [1/1] (short) (narrow) %v542_v6, 8  ;;  %v667_v22 = vld [vmem:[%s1929_s3 + $0x52] sm:$0x1]  ;;  %500 = vxpose.xlu0.b32.start.end [1/1] (short) (narrow) %v498_v11, 8  ;;  %v717_v24 = vrot.slane %v711_v17, 6  ;;  %v671_v25 = vrot.slane %v666_v21, 7  ;;  %v586_v27 = vsel %vm232_vm1, %v585_v14, %v584_v20 }
  0x3b   : > { %v673_v26 = vrot.slane %v667_v22, 6  ;;  %v716_v28 = vsel %vm229_vm0, %v715_v18, %v709_v15  ;;  %v797_v29 = vld [vmem:[%s1929_s3 + $0xb] sm:$0x1]  ;;  %v754_v34 = vld [vmem:[%s1929_s3 + $0x23] sm:$0x1] }
  0x3c   : > { %v798_v30 = vld [vmem:[%s1929_s3 + $0x2b] sm:$0x1]  ;;  %v672_v32 = vsel %vm229_vm0, %v671_v25, %v665_v19  ;;  %v755_v35 = vld [vmem:[%s1929_s3 + $0x43] sm:$0x1]  ;;  %v759_v37 = vrot.slane %v754_v34, 7  ;;  %v718_v38 = vsel %vm232_vm1, %v717_v24, %v716_v28 }
  0x3d   : > { %v799_v31 = vld [vmem:[%s1929_s3 + $0x4b] sm:$0x1]  ;;  %v803_v33 = vrot.slane %v798_v30, 7  ;;  %v753_v36 = vld [vmem:[%s1929_s3 + $0x3] sm:$0x1]  ;;  %v674_v41 = vsel %vm232_vm1, %v673_v26, %v672_v32  ;;  %v761_v43 = vrot.slane %v755_v35, 6 }
  0x3e   : > { %632 = vxpose.xlu1.b32.start.end [1/1] (short) (narrow) %v630_v23, 8  ;;  %588 = vxpose.xlu0.b32.start.end [1/1] (short) (narrow) %v586_v27, 8  ;;  %v805_v39 = vrot.slane %v799_v31, 6  ;;  %v886_v40 = vld [vmem:[%s1929_s3 + $0x3b] sm:$0x1]  ;;  %v760_v47 = vsel %vm229_vm0, %v759_v37, %v753_v36 }
  0x3f   : > { %v804_v42 = vsel %vm229_vm0, %v803_v33, %v797_v29  ;;  %v887_v44 = vld [vmem:[%s1929_s3 + $0x5b] sm:$0x1]  ;;  %v891_v45 = vrot.slane %v886_v40, 7  ;;  %v842_v46 = vld [vmem:[%s1929_s3 + $0x33] sm:$0x1]  ;;  %v762_v56 = vsel %vm232_vm1, %v761_v43, %v760_v47 }
  0x40   : > { %v885_v48 = vld [vmem:[%s1929_s3 + $0x1b] sm:$0x1]  ;;  %v843_v49 = vld [vmem:[%s1929_s3 + $0x53] sm:$0x1]  ;;  %v847_v50 = vrot.slane %v842_v46, 7  ;;  %v806_v53 = vsel %vm232_vm1, %v805_v39, %v804_v42  ;;  %v893_v54 = vrot.slane %v887_v44, 6 }
  0x41   : > { %v841_v51 = vld [vmem:[%s1929_s3 + $0x13] sm:$0x1]  ;;  %v974_v52 = vld [vmem:[%s1929_s3 + $0x2c] sm:$0x1]  ;;  %v892_v57 = vsel %vm229_vm0, %v891_v45, %v885_v48  ;;  %v849_v58 = vrot.slane %v843_v49, 6 }
  0x42   : > { %720 = vxpose.xlu1.b32.start.end [1/1] (short) (narrow) %v718_v38, 8  ;;  %676 = vxpose.xlu0.b32.start.end [1/1] (short) (narrow) %v674_v41, 8  ;;  %v973_v55 = vld [vmem:[%s1929_s3 + $0xc] sm:$0x1]  ;;  %v979_v60 = vrot.slane %v974_v52, 7  ;;  %v848_v62 = vsel %vm229_vm0, %v847_v50, %v841_v51  ;;  %v894_v3 = vsel %vm232_vm1, %v893_v54, %v892_v57 }
  0x43   : > { %v975_v59 = vld [vmem:[%s1929_s3 + $0x4c] sm:$0x1]  ;;  %v930_v61 = vld [vmem:[%s1929_s3 + $0x24] sm:$0x1]  ;;  %v1062_v1 = vld [vmem:[%s1929_s3 + $0x3c] sm:$0x1]  ;;  %v850_v6 = vsel %vm232_vm1, %v849_v58, %v848_v62 }
  0x44   : > { %v931_v63 = vld [vmem:[%s1929_s3 + $0x44] sm:$0x1]  ;;  %v935_v0 = vrot.slane %v930_v61, 7  ;;  %v981_v4 = vrot.slane %v975_v59, 6  ;;  %v1018_v5 = vld [vmem:[%s1929_s3 + $0x34] sm:$0x1]  ;;  %v980_v7 = vsel %vm229_vm0, %v979_v60, %v973_v55 }
  0x45   : > { %v929_v2 = vld [vmem:[%s1929_s3 + $0x4] sm:$0x1]  ;;  %v937_v8 = vrot.slane %v931_v63, 6  ;;  %v1061_v9 = vld [vmem:[%s1929_s3 + $0x1c] sm:$0x1]  ;;  %v1067_v11 = vrot.slane %v1062_v1, 7 }
  0x46   : > { %808 = vxpose.xlu1.b32.start.end [1/1] (short) (narrow) %v806_v53, 8  ;;  %764 = vxpose.xlu0.b32.start.end [1/1] (short) (narrow) %v762_v56, 8  ;;  %v1063_v10 = vld [vmem:[%s1929_s3 + $0x5c] sm:$0x1]  ;;  %v936_v12 = vsel %vm229_vm0, %v935_v0, %v929_v2  ;;  %v1019_v13 = vld [vmem:[%s1929_s3 + $0x54] sm:$0x1]  ;;  %v982_v18 = vsel %vm232_vm1, %v981_v4, %v980_v7 }
  0x47   : > { %v1023_v14 = vrot.slane %v1018_v5, 7  ;;  %v1150_v15 = vld [vmem:[%s1929_s3 + $0x2d] sm:$0x1]  ;;  %v1017_v16 = vld [vmem:[%s1929_s3 + $0x14] sm:$0x1]  ;;  %v1069_v19 = vrot.slane %v1063_v10, 6  ;;  %v938_v20 = vsel %vm232_vm1, %v937_v8, %v936_v12  ;;  %v1068_v21 = vsel %vm229_vm0, %v1067_v11, %v1061_v9 }
  0x48   : > { %v1106_v17 = vld [vmem:[%s1929_s3 + $0x25] sm:$0x1]  ;;  %v1025_v22 = vrot.slane %v1019_v13, 6  ;;  %v1149_v23 = vld [vmem:[%s1929_s3 + $0xd] sm:$0x1]  ;;  %v1155_v25 = vrot.slane %v1150_v15, 7 }
  0x49   : > { %v1151_v24 = vld [vmem:[%s1929_s3 + $0x4d] sm:$0x1]  ;;  %v1024_v26 = vsel %vm229_vm0, %v1023_v14, %v1017_v16  ;;  %v1107_v27 = vld [vmem:[%s1929_s3 + $0x45] sm:$0x1]  ;;  %v1111_v28 = vrot.slane %v1106_v17, 7  ;;  %v1070_v32 = vsel %vm232_vm1, %v1069_v19, %v1068_v21 }
  0x4a   : > { %896 = vxpose.xlu1.b32.start.end [1/1] (short) (narrow) %v894_v3, 8  ;;  %852 = vxpose.xlu0.b32.start.end [1/1] (short) (narrow) %v850_v6, 8  ;;  %v1238_v29 = vld [vmem:[%s1929_s3 + $0x3d] sm:$0x1]  ;;  %v1105_v30 = vld [vmem:[%s1929_s3 + $0x5] sm:$0x1]  ;;  %v1026_v34 = vsel %vm232_vm1, %v1025_v22, %v1024_v26  ;;  %v1156_v35 = vsel %vm229_vm0, %v1155_v25, %v1149_v23 }
  0x4b   : > { %v1194_v31 = vld [vmem:[%s1929_s3 + $0x35] sm:$0x1]  ;;  %v1157_v33 = vrot.slane %v1151_v24, 6  ;;  %v1113_v36 = vrot.slane %v1107_v27, 6  ;;  %v1237_v37 = vld [vmem:[%s1929_s3 + $0x1d] sm:$0x1]  ;;  %v1112_v40 = vsel %vm229_vm0, %v1111_v28, %v1105_v30 }
  0x4c   : > { %v1239_v38 = vld [vmem:[%s1929_s3 + $0x5d] sm:$0x1]  ;;  %v1243_v39 = vrot.slane %v1238_v29, 7  ;;  %v1195_v41 = vld [vmem:[%s1929_s3 + $0x55] sm:$0x1]  ;;  %v1199_v42 = vrot.slane %v1194_v31, 7 }
  0x4d   : > { %v1326_v43 = vld [vmem:[%s1929_s3 + $0x2e] sm:$0x1]  ;;  %v1193_v44 = vld [vmem:[%s1929_s3 + $0x15] sm:$0x1]  ;;  %v1282_v45 = vld [vmem:[%s1929_s3 + $0x26] sm:$0x1]  ;;  %v1158_v46 = vsel %vm232_vm1, %v1157_v33, %v1156_v35  ;;  %v1114_v48 = vsel %vm232_vm1, %v1113_v36, %v1112_v40 }
  0x4e   : > { %984 = vxpose.xlu1.b32.start.end [1/1] (short) (narrow) %v982_v18, 8  ;;  %940 = vxpose.xlu0.b32.start.end [1/1] (short) (narrow) %v938_v20, 8  ;;  %v1245_v47 = vrot.slane %v1239_v38, 6  ;;  %v1244_v49 = vsel %vm229_vm0, %v1243_v39, %v1237_v37  ;;  %v1201_v50 = vrot.slane %v1195_v41, 6  ;;  %v1325_v51 = vld [vmem:[%s1929_s3 + $0xe] sm:$0x1]  ;;  %v1200_v54 = vsel %vm229_vm0, %v1199_v42, %v1193_v44 }
  0x4f   : > { %v1327_v52 = vld [vmem:[%s1929_s3 + $0x4e] sm:$0x1]  ;;  %v1331_v53 = vrot.slane %v1326_v43, 7  ;;  %v1283_v55 = vld [vmem:[%s1929_s3 + $0x46] sm:$0x1]  ;;  %v1287_v56 = vrot.slane %v1282_v45, 7 }
  0x50   : > { %v1414_v57 = vld [vmem:[%s1929_s3 + $0x3e] sm:$0x1]  ;;  %v1281_v58 = vld [vmem:[%s1929_s3 + $0x6] sm:$0x1]  ;;  %v1370_v59 = vld [vmem:[%s1929_s3 + $0x36] sm:$0x1]  ;;  %v1246_v60 = vsel %vm232_vm1, %v1245_v47, %v1244_v49  ;;  %v1202_v62 = vsel %vm232_vm1, %v1201_v50, %v1200_v54 }
  0x51   : > { %v1333_v61 = vrot.slane %v1327_v52, 6  ;;  %v1332_v63 = vsel %vm229_vm0, %v1331_v53, %v1325_v51  ;;  %v1289_v0 = vrot.slane %v1283_v55, 6  ;;  %v1413_v1 = vld [vmem:[%s1929_s3 + $0x1e] sm:$0x1]  ;;  %v1419_v3 = vrot.slane %v1414_v57, 7 }
  0x52   : > { %1072 = vxpose.xlu1.b32.start.end [1/1] (short) (narrow) %v1070_v32, 8  ;;  %1028 = vxpose.xlu0.b32.start.end [1/1] (short) (narrow) %v1026_v34, 8  ;;  %v1415_v2 = vld [vmem:[%s1929_s3 + $0x5e] sm:$0x1]  ;;  %v1288_v4 = vsel %vm229_vm0, %v1287_v56, %v1281_v58  ;;  %v1371_v5 = vld [vmem:[%s1929_s3 + $0x56] sm:$0x1] }
  0x53   : > { %v1375_v6 = vrot.slane %v1370_v59, 7  ;;  %v1502_v7 = vld [vmem:[%s1929_s3 + $0x2f] sm:$0x1]  ;;  %v1369_v8 = vld [vmem:[%s1929_s3 + $0x16] sm:$0x1]  ;;  %v1334_v10 = vsel %vm232_vm1, %v1333_v61, %v1332_v63  ;;  %v1421_v11 = vrot.slane %v1415_v2, 6  ;;  %v1290_v12 = vsel %vm232_vm1, %v1289_v0, %v1288_v4 }
  0x54   : > { %v1458_v9 = vld [vmem:[%s1929_s3 + $0x27] sm:$0x1]  ;;  %v1420_v13 = vsel %vm229_vm0, %v1419_v3, %v1413_v1  ;;  %v1377_v14 = vrot.slane %v1371_v5, 6  ;;  %v1501_v15 = vld [vmem:[%s1929_s3 + $0xf] sm:$0x1]  ;;  %v1507_v17 = vrot.slane %v1502_v7, 7 }
  0x55   : > { %v1503_v16 = vld [vmem:[%s1929_s3 + $0x4f] sm:$0x1]  ;;  %v1376_v18 = vsel %vm229_vm0, %v1375_v6, %v1369_v8  ;;  %v1459_v19 = vld [vmem:[%s1929_s3 + $0x47] sm:$0x1]  ;;  %v1463_v20 = vrot.slane %v1458_v9, 7  ;;  %v1422_v24 = vsel %vm232_vm1, %v1421_v11, %v1420_v13 }
  0x56   : > { %1160 = vxpose.xlu1.b32.start.end [1/1] (short) (narrow) %v1158_v46, 8  ;;  %1116 = vxpose.xlu0.b32.start.end [1/1] (short) (narrow) %v1114_v48, 8  ;;  %v1590_v21 = vld [vmem:[%s1929_s3 + $0x3f] sm:$0x1]  ;;  %v1457_v22 = vld [vmem:[%s1929_s3 + $0x7] sm:$0x1]  ;;  %v1378_v26 = vsel %vm232_vm1, %v1377_v14, %v1376_v18  ;;  %v1508_v27 = vsel %vm229_vm0, %v1507_v17, %v1501_v15 }
  0x57   : > { %v1546_v23 = vld [vmem:[%s1929_s3 + $0x37] sm:$0x1]  ;;  %v1509_v25 = vrot.slane %v1503_v16, 6  ;;  %v1465_v28 = vrot.slane %v1459_v19, 6  ;;  %v1591_v29 = vld [vmem:[%s1929_s3 + $0x5f] sm:$0x1]  ;;  %v1464_v31 = vsel %vm229_vm0, %v1463_v20, %v1457_v22 }
  0x58   : > { %v1595_v30 = vrot.slane %v1590_v21, 7  ;;  %v1589_v32 = vld [vmem:[%s1929_s3 + $0x1f] sm:$0x1]  ;;  %v1547_v33 = vld [vmem:[%s1929_s3 + $0x57] sm:$0x1]  ;;  %v1551_v34 = vrot.slane %v1546_v23, 7 }
  0x59   : > { %v1545_v35 = vld [vmem:[%s1929_s3 + $0x17] sm:$0x1]  ;;  %v1510_v36 = vsel %vm232_vm1, %v1509_v25, %v1508_v27  ;;  %v1597_v37 = vrot.slane %v1591_v29, 6  ;;  %v1466_v38 = vsel %vm232_vm1, %v1465_v28, %v1464_v31  ;;  %v1553_v40 = vrot.slane %v1547_v33, 6 }
  0x5a   : > { %1248 = vxpose.xlu1.b32.start.end [1/1] (short) (narrow) %v1246_v60, 8  ;;  %1204 = vxpose.xlu0.b32.start.end [1/1] (short) (narrow) %v1202_v62, 8  ;;  %v1596_v39 = vsel %vm229_vm0, %v1595_v30, %v1589_v32  ;;  %v1552_v41 = vsel %vm229_vm0, %v1551_v34, %v1545_v35 }
  0x5b   : > { %v1598_v42 = vsel %vm232_vm1, %v1597_v37, %v1596_v39  ;;  %v1554_v43 = vsel %vm232_vm1, %v1553_v40, %v1552_v41 }
  0x5e   : > { %1336 = vxpose.xlu1.b32.start.end [1/1] (short) (narrow) %v1334_v10, 8  ;;  %1292 = vxpose.xlu0.b32.start.end [1/1] (short) (narrow) %v1290_v12, 8 }
  0x62   : > { %1424 = vxpose.xlu1.b32.start.end [1/1] (short) (narrow) %v1422_v24, 8  ;;  %1380 = vxpose.xlu0.b32.start.end [1/1] (short) (narrow) %v1378_v26, 8 }
  0x66   : > { %1512 = vxpose.xlu1.b32.start.end [1/1] (short) (narrow) %v1510_v36, 8  ;;  %1468 = vxpose.xlu0.b32.start.end [1/1] (short) (narrow) %v1466_v38, 8 }
  0x6a   : > { %1600 = vxpose.xlu1.b32.start.end [1/1] (short) (narrow) %v1598_v42, 8  ;;  %1556 = vxpose.xlu0.b32.start.end [1/1] (short) (narrow) %v1554_v43, 8 }
  0xae   : > { %v340_v44 = vpop.trf.xlu1  ;;  %v251_v45 = vpop.trf.xlu0 }
  0xaf   : > { %356 = vst.msk [vmem:[%s2098_s18 + $0x8] sm:$0xf] %vm267_vm2, %v340_v44  ;;  %268 = vst.msk [vmem:[%s2098_s18] sm:$0xf] %vm267_vm2, %v251_v45 }
  0xb2   : > { %v384_v46 = vpop.trf.xlu1  ;;  %v296_v47 = vpop.trf.xlu0 }
  0xb3   : > { %400 = vst.msk [vmem:[%s2098_s18 + $0xc] sm:$0xf] %vm267_vm2, %v384_v46  ;;  %312 = vst.msk [vmem:[%s2098_s18 + $0x4] sm:$0xf] %vm267_vm2, %v296_v47 }
  0xb6   : > { %v472_v48 = vpop.trf.xlu1  ;;  %v428_v49 = vpop.trf.xlu0 }
  0xb7   : > { %488 = vst.msk [vmem:[%s2098_s18 + $0x14] sm:$0xf] %vm267_vm2, %v472_v48  ;;  %444 = vst.msk [vmem:[%s2098_s18 + $0x10] sm:$0xf] %vm267_vm2, %v428_v49 }
  0xba   : > { %v560_v50 = vpop.trf.xlu1  ;;  %v516_v51 = vpop.trf.xlu0 }
  0xbb   : > { %576 = vst.msk [vmem:[%s2098_s18 + $0x1c] sm:$0xf] %vm267_vm2, %v560_v50  ;;  %532 = vst.msk [vmem:[%s2098_s18 + $0x18] sm:$0xf] %vm267_vm2, %v516_v51 }
  0xbe   : > { %v648_v52 = vpop.trf.xlu1  ;;  %v604_v53 = vpop.trf.xlu0 }
  0xbf   : > { %664 = vst.msk [vmem:[%s2098_s18 + $0x24] sm:$0xf] %vm267_vm2, %v648_v52  ;;  %620 = vst.msk [vmem:[%s2098_s18 + $0x20] sm:$0xf] %vm267_vm2, %v604_v53 }
  0xc2   : > { %v736_v54 = vpop.trf.xlu1  ;;  %v692_v55 = vpop.trf.xlu0 }
  0xc3   : > { %752 = vst.msk [vmem:[%s2098_s18 + $0x2c] sm:$0xf] %vm267_vm2, %v736_v54  ;;  %708 = vst.msk [vmem:[%s2098_s18 + $0x28] sm:$0xf] %vm267_vm2, %v692_v55 }
  0xc6   : > { %v824_v56 = vpop.trf.xlu1  ;;  %v780_v57 = vpop.trf.xlu0 }
  0xc7   : > { %840 = vst.msk [vmem:[%s2098_s18 + $0x34] sm:$0xf] %vm267_vm2, %v824_v56  ;;  %796 = vst.msk [vmem:[%s2098_s18 + $0x30] sm:$0xf] %vm267_vm2, %v780_v57 }
  0xca   : > { %v912_v58 = vpop.trf.xlu1  ;;  %v868_v59 = vpop.trf.xlu0 }
  0xcb   : > { %928 = vst.msk [vmem:[%s2098_s18 + $0x3c] sm:$0xf] %vm267_vm2, %v912_v58  ;;  %884 = vst.msk [vmem:[%s2098_s18 + $0x38] sm:$0xf] %vm267_vm2, %v868_v59 }
  0xce   : > { %v1000_v60 = vpop.trf.xlu1  ;;  %v956_v61 = vpop.trf.xlu0 }
  0xcf   : > { %1016 = vst.msk [vmem:[%s2098_s18 + $0x44] sm:$0xf] %vm267_vm2, %v1000_v60  ;;  %972 = vst.msk [vmem:[%s2098_s18 + $0x40] sm:$0xf] %vm267_vm2, %v956_v61 }
  0xd2   : > { %v1088_v62 = vpop.trf.xlu1  ;;  %v1044_v63 = vpop.trf.xlu0 }
  0xd3   : > { %1104 = vst.msk [vmem:[%s2098_s18 + $0x4c] sm:$0xf] %vm267_vm2, %v1088_v62  ;;  %1060 = vst.msk [vmem:[%s2098_s18 + $0x48] sm:$0xf] %vm267_vm2, %v1044_v63 }
  0xd6   : > { %v1176_v0 = vpop.trf.xlu1  ;;  %v1132_v1 = vpop.trf.xlu0 }
  0xd7   : > { %1192 = vst.msk [vmem:[%s2098_s18 + $0x54] sm:$0xf] %vm267_vm2, %v1176_v0  ;;  %1148 = vst.msk [vmem:[%s2098_s18 + $0x50] sm:$0xf] %vm267_vm2, %v1132_v1 }
  0xda   : > { %v1264_v2 = vpop.trf.xlu1  ;;  %v1220_v3 = vpop.trf.xlu0 }
  0xdb   : > { %1280 = vst.msk [vmem:[%s2098_s18 + $0x5c] sm:$0xf] %vm267_vm2, %v1264_v2  ;;  %1236 = vst.msk [vmem:[%s2098_s18 + $0x58] sm:$0xf] %vm267_vm2, %v1220_v3 }
  0xde   : > { %v1352_v4 = vpop.trf.xlu1  ;;  %v1308_v5 = vpop.trf.xlu0 }
  0xdf   : > { %1368 = vst.msk [vmem:[%s2098_s18 + $0x64] sm:$0xf] %vm267_vm2, %v1352_v4  ;;  %1324 = vst.msk [vmem:[%s2098_s18 + $0x60] sm:$0xf] %vm267_vm2, %v1308_v5 }
  0xe2   : > { %v1440_v6 = vpop.trf.xlu1  ;;  %v1396_v7 = vpop.trf.xlu0 }
  0xe3   : > { %1456 = vst.msk [vmem:[%s2098_s18 + $0x6c] sm:$0xf] %vm267_vm2, %v1440_v6  ;;  %1412 = vst.msk [vmem:[%s2098_s18 + $0x68] sm:$0xf] %vm267_vm2, %v1396_v7 }
  0xe6   : > { %v1528_v8 = vpop.trf.xlu1  ;;  %v1484_v9 = vpop.trf.xlu0 }
  0xe7   : > { %1544 = vst.msk [vmem:[%s2098_s18 + $0x74] sm:$0xf] %vm267_vm2, %v1528_v8  ;;  %1500 = vst.msk [vmem:[%s2098_s18 + $0x70] sm:$0xf] %vm267_vm2, %v1484_v9 }
  0xea   : > { %v1616_v10 = vpop.trf.xlu1  ;;  %v1572_v11 = vpop.trf.xlu0 }
  0xeb   : > { %1632 = vst.msk [vmem:[%s2098_s18 + $0x7c] sm:$0xf] %vm267_vm2, %v1616_v10  ;;  %1588 = vst.msk [vmem:[%s2098_s18 + $0x78] sm:$0xf] %vm267_vm2, %v1572_v11 }
  0xec PF: > { %s11_s12 = sadd.s32 1, %s1854_s12   ;;  %s2187_s6 = smov %s1834_s7 }
  0xed   : > { %p8_p12 = scmp.ge.s32.totalorder %s11_s12, 18   ;;  %s2188_s7 = smov %s1917_s19 }
  0xee   : > { %s2189_s8 = smov %s1846_s10  ;;  %s2190_s9 = smov %s1850_s11 }
  0xef   : > { %s2191_s10 = smov %s2194_s13  ;;  %s2192_s11 = smov %s2198_s14 }
  0xf0   :  { %10 = sbr.rel (!%p8_p12) target bundleno = 4 (0x4), region = 97 }

</bundles_post_ra>
